<compile_context>
chip_gen: v7x
topology: tpu7x:2x2x1
jax: 0.10.0
libtpu: 0.0.40
codegen_flags: <defaults>
</compile_context>

<pallas_src>
import functools

import jax
import jax.numpy as jnp
from jax.experimental import pallas as pl
from jax.experimental.pallas import tpu as pltpu


def _conv1x1_clamp_kernel(x_ref, w_ref, b_ref, o_ref, *, min_val, max_val):
    # x_ref: (Cin, tm)   w_ref: (Cout, Cin)   b_ref: (Cout, 1)   o_ref: (Cout, tm)
    acc = jnp.dot(w_ref[...], x_ref[...], preferred_element_type=jnp.float32)
    acc = acc + b_ref[...]                    # bias broadcasts over the lane axis
    if min_val is not None:                   # clamp_min (None -> identity)
        acc = jnp.maximum(acc, jnp.float32(min_val))
    if max_val is not None:                   # clamp_max (None -> identity)
        acc = jnp.minimum(acc, jnp.float32(max_val))
    o_ref[...] = acc.astype(o_ref.dtype)


def conv1x1_stride_pad_clamp(x, w, b, *, stride=2, padding=1,
                             min_val=None, max_val=None, tile_m=16384):
    """x: (N, Cin, H, W) NCHW float32.  w: (Cout, Cin, 1, 1).  b: (Cout,)."""
    N, Cin, H, W = x.shape
    Cout = w.shape[0]

    # PyTorch output size; kernel_size=1 makes dilation irrelevant.
    Ho = (H + 2 * padding - 1) // stride + 1
    Wo = (W + 2 * padding - 1) // stride + 1

    # First output index whose stride sample lands inside the unpadded input,
    # and its source coordinate (same for H and W since padding/stride match).
    i0 = -(-padding // stride)                # ceil(padding / stride)
    s0 = i0 * stride - padding

    # In-bounds strided samples only: no full-size jnp.pad of x.
    x_int = x[:, :, s0::stride, s0::stride]   # (N, Cin, Hi, Wi)
    Hi, Wi = x_int.shape[2], x_int.shape[3]

    # Channels first so batch+spatial can be flattened into one lane-dense axis.
    # Border output rows/cols sample the zero padding -> contribute only bias;
    # fill them with zeros so the kernel's matmul yields exactly bias there.
    xs = jnp.transpose(x_int, (1, 0, 2, 3))   # (Cin, N, Hi, Wi)
    xs = jnp.pad(xs, ((0, 0), (0, 0),
                      (i0, Ho - i0 - Hi), (i0, Wo - i0 - Wi)))  # (Cin, N, Ho, Wo)

    # Fold batch into the pixel axis: one big lane-dense matmul per call.
    M = N * Ho * Wo
    x2 = xs.reshape(Cin, M)

    # --- Tile selection ---------------------------------------------------
    # Lane-dense tiles (multiples of 128).  Big tiles amortize the ~0.35 us
    # per-grid-step overhead; when everything fits in one tile, split in two so
    # the parallel grid axis can use both v7x TensorCores.
    tile_m = max(128, (int(tile_m) // 128) * 128)      # defensive round-down
    M128 = ((M + 127) // 128) * 128
    if M128 <= tile_m:
        n128 = M128 // 128
        tm = max(128, ((n128 + 1) // 2) * 128)         # ~half, >=2 tiles if possible
    else:
        tm = tile_m
    Mp = ((M + tm - 1) // tm) * tm
    if Mp != M:
        x2 = jnp.pad(x2, ((0, 0), (0, Mp - M)))        # small tail pad only

    w2 = w.reshape(Cout, Cin)
    b2 = b.reshape(Cout, 1)

    kernel = functools.partial(_conv1x1_clamp_kernel,
                               min_val=min_val, max_val=max_val)

    # Double-buffered x + out blocks, plus resident weight/bias, plus headroom.
    vmem_limit = min(2 * (Cin + Cout) * tm * 4 + 2 * Cout * Cin * 4 + (4 << 20),
                     64 << 20)

    out2 = pl.pallas_call(
        kernel,
        out_shape=jax.ShapeDtypeStruct((Cout, Mp), x.dtype),
        grid=(Mp // tm,),
        in_specs=[
            pl.BlockSpec((Cin, tm), lambda m: (0, m)),     # (Cin, tm) per step
            pl.BlockSpec((Cout, Cin), lambda m: (0, 0)),   # whole weight, resident
            pl.BlockSpec((Cout, 1), lambda m: (0, 0)),     # whole bias, resident
        ],
        out_specs=pl.BlockSpec((Cout, tm), lambda m: (0, m)),
        compiler_params=pltpu.CompilerParams(
            dimension_semantics=("parallel",),
            vmem_limit_bytes=vmem_limit),
    )(x2, w2, b2)

    out = out2[:, :M].reshape(Cout, N, Ho, Wo)
    return jnp.transpose(out, (1, 0, 2, 3))               # (N, Cout, Ho, Wo)


if __name__ == "__main__":
    key = jax.random.PRNGKey(0)
    k_x, k_w, k_b = jax.random.split(key, 3)

    # Small shapes consistent with the module: Conv2d requires Cin = 32.
    N, Cin, H, W = 2, 32, 16, 16
    Cout = 32

    x = jax.random.normal(k_x, (N, Cin, H, W), dtype=jnp.float32)
    # Deterministic synthetic parameters (shapes from Conv2d(32, 32, 1)).
    fan_in = Cin * 1 * 1
    bound = 1.0 / (fan_in ** 0.5)
    w = jax.random.uniform(k_w, (Cout, Cin, 1, 1), dtype=jnp.float32,
                           minval=-bound, maxval=bound)
    b = jax.random.uniform(k_b, (Cout,), dtype=jnp.float32,
                           minval=-bound, maxval=bound)

    fn = jax.jit(functools.partial(conv1x1_stride_pad_clamp,
                                   stride=2, padding=1,
                                   min_val=None, max_val=None))
    out = jax.block_until_ready(fn(x, w, b))

    # Pure-JAX reference (same math as the PyTorch module, independent path).
    xp = jnp.pad(x, ((0, 0), (0, 0), (1, 1), (1, 1)))[:, :, ::2, ::2]
    ref = jnp.einsum("nchw,oc->nohw", xp, w.reshape(Cout, Cin)) + b[None, :, None, None]
    assert out.shape == ref.shape, (out.shape, ref.shape)
    assert jnp.allclose(out, ref, atol=1e-5, rtol=1e-5)

    print("KERNEL_OK")
</pallas_src>

<mosaic_0001>
module attributes {stable_mosaic.version = 11 : i64} {
  func.func @_conv1x1_clamp_kernel(%arg0: i32, %arg1: memref<32x128xf32, #tpu.memory_space<vmem>>, %arg2: memref<32x32xf32, #tpu.memory_space<vmem>>, %arg3: memref<32x1xf32, #tpu.memory_space<vmem>>, %arg4: memref<32x128xf32, #tpu.memory_space<vmem>>) attributes {dimension_semantics = [#tpu.dimension_semantics<parallel>], iteration_bounds = array<i64: 2>, scalar_prefetch = 0 : i64, scratch_operands = 0 : i64, tpu.core_type = #tpu.core_type<tc>, window_params = [{transform_indices = @transform_0, window_bounds = array<i64: 32, 128>}, {pipeline_mode = #tpu.pipeline_mode<synchronous>, transform_indices = @transform_1, window_bounds = array<i64: 32, 32>}, {pipeline_mode = #tpu.pipeline_mode<synchronous>, transform_indices = @transform_2, window_bounds = array<i64: 32, 1>}, {transform_indices = @transform_3, window_bounds = array<i64: 32, 128>}]} {
    %c0 = arith.constant 0 : index
    %c0_0 = arith.constant 0 : index
    %0 = vector.load %arg2[%c0, %c0_0] : memref<32x32xf32, #tpu.memory_space<vmem>>, vector<32x32xf32>
    %c0_1 = arith.constant 0 : index
    %c0_2 = arith.constant 0 : index
    %1 = vector.load %arg1[%c0_1, %c0_2] : memref<32x128xf32, #tpu.memory_space<vmem>>, vector<32x128xf32>
    %cst = arith.constant dense<0.000000e+00> : vector<32x128xf32>
    %2 = tpu.matmul %0, %1, %cst {dimension_numbers = #tpu.dot_dimension_numbers<[1], [0], [0], [1], [0, 0, 1, 1], [], []>} : vector<32x32xf32>, vector<32x128xf32>, vector<32x128xf32> -> vector<32x128xf32>
    %c0_3 = arith.constant 0 : index
    %c0_4 = arith.constant 0 : index
    %3 = vector.load %arg3[%c0_3, %c0_4] : memref<32x1xf32, #tpu.memory_space<vmem>>, vector<32x1xf32>
    %4 = vector.broadcast %3 : vector<32x1xf32> to vector<32x128xf32>
    %5 = arith.addf %2, %4 : vector<32x128xf32>
    %c0_5 = arith.constant 0 : index
    %c0_6 = arith.constant 0 : index
    %6 = vector.load %arg4[%c0_5, %c0_6] : memref<32x128xf32, #tpu.memory_space<vmem>>, vector<32x128xf32>
    tpu.vector_store %arg4[%c0_5, %c0_6], %5 {strides = array<i32>} : memref<32x128xf32, #tpu.memory_space<vmem>>, vector<32x128xf32>,
    return
  }
  func.func @transform_0(%arg0: i32) -> (i32, i32) {
    %c0_i32 = arith.constant 0 : i32
    %c0_i32_0 = arith.constant 0 : i32
    return %c0_i32, %arg0 : i32, i32
  }
  func.func @transform_1(%arg0: i32) -> (i32, i32) {
    %c0_i32 = arith.constant 0 : i32
    %c0_i32_0 = arith.constant 0 : i32
    %c0_i32_1 = arith.constant 0 : i32
    return %c0_i32, %c0_i32_0 : i32, i32
  }
  func.func @transform_2(%arg0: i32) -> (i32, i32) {
    %c0_i32 = arith.constant 0 : i32
    %c0_i32_0 = arith.constant 0 : i32
    %c0_i32_1 = arith.constant 0 : i32
    return %c0_i32, %c0_i32_0 : i32, i32
  }
  func.func @transform_3(%arg0: i32) -> (i32, i32) {
    %c0_i32 = arith.constant 0 : i32
    %c0_i32_0 = arith.constant 0 : i32
    return %c0_i32, %arg0 : i32, i32
  }
}

</mosaic_0001>

<bundles_post_ra>
// kernel: conv1x1_stride_pad_clamp.1
= control target key start
LH: loop header
LB: loop body
LE: loop exit
PB: predicated region body
PF: predicated region fallthrough
CT: control target
= control target key end

     0   :  { %s577_s12 = smov 0   ;;  %s579_s13 = smov 0   ;;  %s669_s0 = inlined_call_operand.vmem [shape: f32[32,256], index: 0, kind: input, shape index: {}]   ;;  %s670_s1 = inlined_call_operand.vmem [shape: f32[32,32], index: 1, kind: input, shape index: {}]   ;;  %s671_s2 = inlined_call_operand.vmem [shape: f32[32,1], index: 2, kind: input, shape index: {}]   ;;  %s672_s3 = inlined_call_operand.vmem [shape: f32[32,256], index: 3, kind: output, shape index: {}]  }
   0x1   :  { %s581_s14 = smov 0  }
   0x2 LB: > { %s454_s15 = sadd.s32 4294967295, %s554_s14   ;;  %s594_s16 = sadd.s32 1, %s554_s14   ;;  %s554_s14 = sphi %s581_s14, %s676_s14   ;;  %s550_s13 = sphi %s579_s13, %s675_s13   ;;  %s546_s12 = sphi %s577_s12, %s674_s12  }
   0x3   : > { %s17_s17 = ssub.s32 %s554_s14, %s594_s16  ;;  %s20_s18 = sadd.s32 1, %s550_s13 }
   0x4   : > { %p18_p0 = scmp.eq.s32.totalorder %s17_s17, 0  ;;  %p27_p1 = scmp.ne.s32.totalorder %s550_s13, %s546_s12 }
   0x5   : > { %p28_p2 = scmp.eq.s32.totalorder %s554_s14, 0  ;;  %p99_p3 = scmp.eq.s32.totalorder %s454_s15, 1 }
   0x6   : > { %s605_s19 = scalar_select %p18_p0, %s550_s13, %s20_s18  }
   0x7   : > { %p29_p4 = por %p28_p2, %p27_p1  ;;  %p607_p5 = por %p99_p3, %p27_p1 }
   0x8   : > { %p457_p6 = scmp.ge.s32.totalorder %s554_s14, 2 }
   0xa   : > { %127 = sbr.rel (%p457_p6) target bundleno = 24 (0x18), region = 24 }
  0x11   : > { %130 = sbr.rel (!%p29_p4) target bundleno = 24 (0x18), region = 28  ;;  %s132_s21 = sand.u32 (%p29_p4), 1, %s550_s13  }
  0x12   : > { %s459_s22 = sshll.u32 (%p29_p4), %s554_s14, 3  ;;  %s458_s23 = sshll.u32 (%p29_p4), %s132_s21, 5 }
  0x13   : > { %s136_s26 = scalar_lea.vmem (%p29_p4), %s669_s0, %s459_s22  ;;  %s134_s27 = scalar_lea.vmem (%p29_p4), [#allocation2], %s458_s23 }
  0x14   : > { %v170_v0 = vld [vmem:[%s136_s26] sm:$0xff] (%p29_p4)  ;;  %v172_v1 = vld [vmem:[%s136_s26 + $0x10] sm:$0xff] (%p29_p4) }
  0x15   : > { %v174_v2 = vld [vmem:[%s136_s26 + $0x20] sm:$0xff] (%p29_p4)  ;;  %171 = vst [vmem:[%s134_s27] sm:$0xff] (%p29_p4), %v170_v0  ;;  %173 = vst [vmem:[%s134_s27 + $0x8] sm:$0xff] (%p29_p4), %v172_v1  ;;  %v176_v3 = vld [vmem:[%s136_s26 + $0x30] sm:$0xff] (%p29_p4) }
  0x16   : > { %175 = vst [vmem:[%s134_s27 + $0x10] sm:$0xff] (%p29_p4), %v174_v2  ;;  %177 = vst [vmem:[%s134_s27 + $0x18] sm:$0xff] (%p29_p4), %v176_v3 }
  0x18 PF: > { %p460_p7 = scmp.ge.s32.totalorder %s554_s14, 1  ;;  %p182_p8 = scmp.lt.s32.totalorder %s554_s14, 3 }
  0x1a   : > { %p183_p9 = pnand %p460_p7, %p182_p8 }
  0x1b   : > { %s189_s28 = sand.u32 (!%p183_p9), 1, %s546_s12   ;;  %v211_v4 = vld [vmem:[%s670_s1] sm:$0xff] (!%p183_p9)  ;;  %vm243_vm0 = vcmask (!%p183_p9), 261120   ;;  %v213_v5 = vld [vmem:[%s670_s1 + $0x10] sm:$0xff] (!%p183_p9)  ;;  %v556_v8 = vmov (!%p183_p9), 0   ;;  %v222_v15 = vld [vmem:[%s671_s2 + $0x18] sm:$0xff] (!%p183_p9) }
  0x1c   : > { %186 = sbr.rel (%p183_p9) target bundleno = 265 (0x109), region = 66  ;;  %s626_s6 = sshll.u32 (!%p183_p9), %s189_s28, 5  ;;  %487 = vmatprep.mubr.msk.f32.mxu0 (!%p183_p9), %vm243_vm0, %v211_v4  ;;  %490 = vmatprep.mubr.msk.f32.mxu1 (!%p183_p9), %vm243_vm0, %v213_v5  ;;  %v221_v6 = vld [vmem:[%s671_s2 + $0x10] sm:$0xff] (!%p183_p9)  ;;  %v219_v7 = vld [vmem:[%s671_s2] sm:$0xff] (!%p183_p9)  ;;  %v220_v16 = vld [vmem:[%s671_s2 + $0x8] sm:$0xff] (!%p183_p9) }
  0x1d   : > { %531 = vset.pattern.permute.xlu1 (!%p183_p9), %v556_v8  ;;  %530 = vset.pattern.permute.xlu0 (!%p183_p9), %v556_v8  ;;  %s191_s11 = scalar_lea.vmem (!%p183_p9), [#allocation2], %s626_s6  ;;  %v212_v17 = vld [vmem:[%s670_s1 + $0x8] sm:$0xff] (!%p183_p9)  ;;  %v214_v18 = vld [vmem:[%s670_s1 + $0x18] sm:$0xff] (!%p183_p9)  ;;  %s210_s26 = scalar_lea.vmem (!%p183_p9), [#allocation3], %s626_s6 }
  0x1e   : > { %v215_v9 = vld [vmem:[%s191_s11] sm:$0xff] (!%p183_p9)  ;;  %v216_v10 = vld [vmem:[%s191_s11 + $0x8] sm:$0xff] (!%p183_p9)  ;;  %v217_v11 = vld [vmem:[%s191_s11 + $0x10] sm:$0xff] (!%p183_p9)  ;;  %235 = vperm.xlu1 (!%p183_p9), %531, %v221_v6   ;;  %225 = vperm.xlu0 (!%p183_p9), %530, %v219_v7  }
  0x1f   : > { %v493_v12 = vpack.c.bf16 (!%p183_p9), %v216_v10, %v215_v9  ;;  %v218_v13 = vld [vmem:[%s191_s11 + $0x18] sm:$0xff] (!%p183_p9) }
  0x20   : > { %v497_v14 = vpack.c.bf16 (!%p183_p9), %v218_v13, %v217_v11 }
  0x21   : > { %494 = vmatprep.subr.bf16.mxu0 (!%p183_p9), %v493_v12  ;;  %501 = vmatprep.subr.bf16.mxu1 (!%p183_p9), %v493_v12 }
  0x22   : > { %496 = vmatpush3.bf16.msra.mxu0 (!%p183_p9), %v493_v12  ;;  %503 = vmatpush3.bf16.msra.mxu1 (!%p183_p9), %v493_v12 }
  0x23   : > { %498 = vmatprep.subr.bf16.mxu0 %v497_v14  ;;  %502 = vmatprep.subr.bf16.mxu1 %v497_v14  ;;  %s468_s27 = sshll.u32 (%p607_p5), %s454_s15, 3 }
  0x24   : > { %240 = vperm.xlu1 %531, %v222_v15   ;;  %230 = vperm.xlu0 %530, %v220_v16   ;;  %s353_s30 = scalar_lea.vmem (%p607_p5), %s672_s3, %s468_s27 }
  0x26   : > { %500 = vmatpush3.bf16.msra.mxu0 %v497_v14  ;;  %504 = vmatpush3.bf16.msra.mxu1 %v497_v14 }
  0x29   : > { %488 = vmatmul.mubr.msk.f32.vlgmr.msra.gmra.mrb[0].mxu0 %vm243_vm0, %v212_v17  ;;  %491 = vmatmul.mubr.msk.f32.vlgmr.msra.gmra.mrb[0].mxu1 %vm243_vm0, %v214_v18 }
  0x9d   : > { %v236_v19 = vpop.permute.xlu1 %235  ;;  %v226_v20 = vpop.permute.xlu0 %225 }
  0xa3   : > { %v241_v21 = vpop.permute.xlu1 %240  ;;  %v231_v22 = vpop.permute.xlu0 %230 }
  0xfa   : > { %351 = sbr.rel (!%p607_p5) target bundleno = 265 (0x109), region = 74 }
  0xfc   : > { %v489_v23 = vpop.f32.mrb[0].mxu0  ;;  %v492_v24 = vpop.f32.mrb[0].mxu1 }
  0xfd   : > { %v328_v25 = vadd.f32 %v489_v23, %v231_v22  ;;  %v338_v26 = vadd.f32 %v492_v24, %v241_v21  ;;  %v322_v27 = vpop.f32.mrb[1].mxu0  ;;  %v332_v28 = vpop.f32.mrb[1].mxu1 }
  0xfe   : > { %v323_v29 = vadd.f32 %v322_v27, %v226_v20  ;;  %v333_v30 = vadd.f32 %v332_v28, %v236_v19 }
  0xff   : > { %342 = vst [vmem:[%s210_s26 + $0x8] sm:$0xff] %v328_v25  ;;  %344 = vst [vmem:[%s210_s26 + $0x18] sm:$0xff] %v338_v26 }
 0x100   : > { %341 = vst [vmem:[%s210_s26] sm:$0xff] %v323_v29  ;;  %343 = vst [vmem:[%s210_s26 + $0x10] sm:$0xff] %v333_v30 }
 0x106   : > { %v389_v32 = vld [vmem:[%s210_s26 + $0x8] sm:$0xff]  ;;  %v393_v34 = vld [vmem:[%s210_s26 + $0x18] sm:$0xff] }
 0x107   : > { %v387_v31 = vld [vmem:[%s210_s26] sm:$0xff]  ;;  %v391_v33 = vld [vmem:[%s210_s26 + $0x10] sm:$0xff]  ;;  %390 = vst [vmem:[%s353_s30 + $0x10] sm:$0xff] %v389_v32  ;;  %394 = vst [vmem:[%s353_s30 + $0x30] sm:$0xff] %v393_v34 }
 0x108   : > { %388 = vst [vmem:[%s353_s30] sm:$0xff] %v387_v31  ;;  %392 = vst [vmem:[%s353_s30 + $0x20] sm:$0xff] %v391_v33 }
 0x109 PF: > { %p10_p10 = scmp.ge.s32.totalorder %s594_s16, 4   ;;  %s674_s12 = smov %s550_s13 }
 0x10a   : > { %s675_s13 = smov %s605_s19  ;;  %s676_s14 = smov %s594_s16 }
 0x10b   :  { %12 = sbr.rel (!%p10_p10) target bundleno = 2 (0x2), region = 143 }

</bundles_post_ra>
